<compile_context>
chip_gen: v5e
topology: v5e:2x2
jax: 0.10.0
libtpu: 0.0.40
codegen_flags: <defaults>
</compile_context>

<pallas_src>
import math
from functools import partial

import jax
import jax.numpy as jnp
from jax import lax
from jax.experimental import pallas as pl
from jax.experimental.pallas import tpu as pltpu

_MIB = 1024 * 1024
_VMEM_CAP_CACHE = {}


def _round_up(x, m):
    return ((x + m - 1) // m) * m


def _vmem_capacity_bytes():
    """Physical VMEM per core (bytes); conservative 64 MiB fallback (v7x)."""
    if "cap" not in _VMEM_CAP_CACHE:
        cap = 64 * _MIB
        try:
            info = pltpu.get_tpu_info()
            cap = int(getattr(info, "vmem_capacity_bytes", cap)) or cap
        except Exception:
            pass
        _VMEM_CAP_CACHE["cap"] = cap
    return _VMEM_CAP_CACHE["cap"]


def _apply_act(h, hidden_act, approx_gelu):
    if hidden_act == "gelu":
        if approx_gelu:
            # EUP-routed tanh approximation: useful when VALU-bound (small D).
            return jax.nn.gelu(h, approximate=True)
        # Exact-erf gelu, bit-faithful to the module's self.gelu.
        return h * 0.5 * (1.0 + lax.erf(h / math.sqrt(2.0)))
    if hidden_act == "relu":
        return jnp.maximum(h, 0.0)
    if hidden_act == "swish":
        return h * jax.nn.sigmoid(h)
    if hidden_act == "tanh":
        return jnp.tanh(h)
    if hidden_act == "sigmoid":
        return jax.nn.sigmoid(h)
    raise ValueError(f"unsupported hidden_act: {hidden_act}")


# ----------------------------------------------------------------------------
# Kernels
# ----------------------------------------------------------------------------
def _ffn_kernel_resident(x_ref, w1_ref, b1_ref, w2_ref, b2_ref, o_ref, *,
                         compute_dtype, hidden_act, approx_gelu):
    """Single hidden step: weights resident, no accumulator scratch.

    x_ref : (tm, Dp)   w1_ref: (Dp, Hp)  b1_ref: (1, Hp)
    w2_ref: (Hp, Dp)   b2_ref: (1, Dp)   o_ref : (tm, Dp)
    """
    x = x_ref[...]
    w1 = w1_ref[...]
    w2 = w2_ref[...]
    if compute_dtype is not None:
        # In-kernel cast (VALU, hides under the MXU) — no wrapper HBM pass.
        x = x.astype(compute_dtype)
        w1 = w1.astype(compute_dtype)
        w2 = w2.astype(compute_dtype)
    h = jnp.dot(x, w1, preferred_element_type=jnp.float32)
    h = _apply_act(h + b1_ref[...].astype(jnp.float32), hidden_act, approx_gelu)
    # TODO(synk): training-mode dropout would go here (pltpu.prng_seed /
    # pltpu.prng_random_bits); identity in inference.
    h = h.astype(w2.dtype)  # bf16 MXU operand path; f32 when compute_dtype=None
    out = jnp.dot(h, w2, preferred_element_type=jnp.float32)
    o_ref[...] = (out + b2_ref[...].astype(jnp.float32)).astype(o_ref.dtype)


def _ffn_kernel_tiled(x_ref, w1_ref, b1_ref, w2_ref, b2_ref, o_ref, acc_ref, *,
                      compute_dtype, hidden_act, approx_gelu):
    """Hidden axis tiled (grid axis 1 = reduction), f32 VMEM accumulator.

    x_ref : (tm, Dp)   w1_ref: (Dp, th)  b1_ref: (1, th)
    w2_ref: (th, Dp)   b2_ref: (1, Dp)   o_ref : (tm, Dp)
    acc_ref: (tm, Dp) f32 scratch, resident across the hidden axis.
    """
    k = pl.program_id(1)

    @pl.when(k == 0)
    def _():
        acc_ref[...] = jnp.zeros_like(acc_ref)

    x = x_ref[...]
    w1 = w1_ref[...]
    w2 = w2_ref[...]
    if compute_dtype is not None:
        x = x.astype(compute_dtype)
        w1 = w1.astype(compute_dtype)
        w2 = w2.astype(compute_dtype)
    h = jnp.dot(x, w1, preferred_element_type=jnp.float32)
    h = _apply_act(h + b1_ref[...].astype(jnp.float32), hidden_act, approx_gelu)
    # TODO(synk): training-mode dropout would go here; identity in inference.
    h = h.astype(w2.dtype)
    acc_ref[...] += jnp.dot(h, w2, preferred_element_type=jnp.float32)

    @pl.when(k == pl.num_programs(1) - 1)
    def _():
        o_ref[...] = (acc_ref[...] + b2_ref[...].astype(jnp.float32)).astype(o_ref.dtype)


# ----------------------------------------------------------------------------
# Wrapper
# ----------------------------------------------------------------------------
@partial(jax.jit,
         static_argnames=("compute_dtype", "hidden_act", "approx_gelu", "tm", "th"))
def flex_feed_forward(x, w1, b1, w2, b2, *, compute_dtype=None,
                      hidden_act="gelu", approx_gelu=False, tm=None, th=None):
    """x: [B, S, D]; w1: [D, H]; b1: [1, H] or [H]; w2: [H, D]; b2: [1, D] or [D].

    compute_dtype: optional MXU operand dtype (jnp.bfloat16 is the fast path
    on v5e/v6e/v7x; store the weights in bf16 at the caller to also halve
    weight HBM traffic). Biases and accumulation are always float32.
    tm / th optionally cap the row / hidden tile sizes (rounded to 8 / 128).
    Returns [B, S, D] in x.dtype.
    """
    B, S, D = x.shape
    H = w1.shape[1]
    rows = B * S
    out_dtype = x.dtype

    b1 = b1.reshape(1, H)
    b2 = b2.reshape(1, D)

    Dp = _round_up(D, 128)
    Hp = _round_up(H, 128)

    x_sz = jnp.dtype(x.dtype).itemsize
    w1_sz = jnp.dtype(w1.dtype).itemsize
    w2_sz = jnp.dtype(w2.dtype).itemsize
    o_sz = jnp.dtype(out_dtype).itemsize

    # ---- generation-aware VMEM budget --------------------------------------
    cap = _vmem_capacity_bytes()                      # 128 MiB v5e/v6e, 64 MiB v7x
    vmem_limit = max(32 * _MIB, min(100 * _MIB, cap * 3 // 4))
    budget = int(vmem_limit * 0.85)                   # headroom for compiler scratch

    rows8 = _round_up(rows, 8)
    tm_user = None if tm is None else max(8, (tm // 8) * 8)

    # ---- (a) resident-weight / single-reduction-step path ------------------
    w_resident_bytes = 2 * Dp * Hp * (w1_sz + w2_sz)  # assume double-buffered
    resident = (th is None or max(128, (th // 128) * 128) >= Hp) and \
               (w_resident_bytes <= int(budget * 0.6))

    if resident:
        th_sel = Hp
        rem = budget - w_resident_bytes
        per_row = Dp * 2 * (x_sz + o_sz) + Hp * 12    # x/out tiles (2x) + h temps
        tm_budget = max(8, (rem // per_row) // 8 * 8)
        tm_cap = tm_user if tm_user is not None else 1024
        tm_sel = max(8, min(tm_budget, tm_cap, rows8))
        # Split a lone row tile so v7x's two TensorCores both get work
        # (cheap / neutral on single-TC v5e/v6e).
        if rows8 >= 16 and tm_sel >= rows8:
            tm_sel = _round_up((rows + 1) // 2, 8)
    else:
        # ---- (b) hidden axis tiled: resident f32 accumulator ---------------
        tm_base = tm_user if tm_user is not None else 512
        tm_sel = max(8, min(tm_base, rows8))
        while True:
            fixed = tm_sel * Dp * (2 * x_sz + 2 * o_sz + 4)       # x/out (2x) + acc
            denom = 2 * Dp * (w1_sz + w2_sz) + tm_sel * 12        # W tiles (2x) + h temps
            th_sel = ((budget - fixed) // denom // 128) * 128 if budget > fixed else 0
            if th_sel >= 128 or tm_sel == 8:
                break
            tm_sel = max(8, (tm_sel // 2) // 8 * 8)
        th_sel = max(128, min(th_sel, Hp))
        if th is not None:
            th_sel = max(128, min((th // 128) * 128, th_sel))
        Hp = _round_up(H, th_sel)                     # pad H so th divides exactly

    rows_padded = _round_up(rows, tm_sel)

    # ---- data prep (pad only when needed; never cast here) -----------------
    x2 = x.reshape(rows, D)
    pad_rows = rows_padded - rows
    pad_d = Dp - D
    pad_h = Hp - H
    if pad_rows or pad_d:
        x2 = jnp.pad(x2, ((0, pad_rows), (0, pad_d)))
    if pad_d or pad_h:
        w1p = jnp.pad(w1, ((0, pad_d), (0, pad_h)))
        b1p = jnp.pad(b1, ((0, 0), (0, pad_h)))
        w2p = jnp.pad(w2, ((0, pad_h), (0, pad_d)))
        b2p = jnp.pad(b2, ((0, 0), (0, pad_d)))
    else:
        w1p, b1p, w2p, b2p = w1, b1, w2, b2

    grid_rows = rows_padded // tm_sel
    h_steps = Hp // th_sel

    if h_steps == 1:
        kernel = partial(_ffn_kernel_resident, compute_dtype=compute_dtype,
                         hidden_act=hidden_act, approx_gelu=approx_gelu)
        grid = (grid_rows,)
        in_specs = [
            pl.BlockSpec((tm_sel, Dp), lambda i: (i, 0)),   # x row tile
            pl.BlockSpec((Dp, Hp), lambda i: (0, 0)),       # W1 (resident)
            pl.BlockSpec((1, Hp), lambda i: (0, 0)),        # b1 (resident)
            pl.BlockSpec((Hp, Dp), lambda i: (0, 0)),       # W2 (resident)
            pl.BlockSpec((1, Dp), lambda i: (0, 0)),        # b2 (resident)
        ]
        out_specs = pl.BlockSpec((tm_sel, Dp), lambda i: (i, 0))
        scratch = ()
        dims = ("parallel",)
    else:
        kernel = partial(_ffn_kernel_tiled, compute_dtype=compute_dtype,
                         hidden_act=hidden_act, approx_gelu=approx_gelu)
        grid = (grid_rows, h_steps)
        in_specs = [
            pl.BlockSpec((tm_sel, Dp), lambda i, k: (i, 0)),  # x row tile (reused over k)
            pl.BlockSpec((Dp, th_sel), lambda i, k: (0, k)),  # W1 hidden chunk
            pl.BlockSpec((1, th_sel), lambda i, k: (0, k)),   # b1 hidden chunk
            pl.BlockSpec((th_sel, Dp), lambda i, k: (k, 0)),  # W2 hidden chunk
            pl.BlockSpec((1, Dp), lambda i, k: (0, 0)),       # b2 (constant)
        ]
        out_specs = pl.BlockSpec((tm_sel, Dp), lambda i, k: (i, 0))
        scratch = (pltpu.VMEM((tm_sel, Dp), jnp.float32),)
        dims = ("parallel", "arbitrary")

    out2 = pl.pallas_call(
        kernel,
        out_shape=jax.ShapeDtypeStruct((rows_padded, Dp), out_dtype),
        grid_spec=pltpu.PrefetchScalarGridSpec(
            num_scalar_prefetch=0,
            grid=grid,
            in_specs=in_specs,
            out_specs=out_specs,
            scratch_shapes=scratch,
        ),
        compiler_params=pltpu.CompilerParams(
            dimension_semantics=dims,
            vmem_limit_bytes=int(vmem_limit),
        ),
    )(x2, w1p, b1p, w2p, b2p)

    out2 = out2[:rows, :D]
    return out2.reshape(B, S, D)


# ----------------------------------------------------------------------------
# Reference & self-test
# ----------------------------------------------------------------------------
def _reference(x2, w1, b1, w2, b2):
    h = x2 @ w1 + b1
    h = h * 0.5 * (1.0 + lax.erf(h / math.sqrt(2.0)))
    return h @ w2 + b2


if __name__ == "__main__":
    # Module hyperparams: dim=32, expansion_factor=4, dropout_prob=0.0 (eval),
    # hidden_act='gelu', layer_norm_eps=1e-12 (LayerNorm unused in forward).
    B, S, D = 2, 8, 32
    E = 4
    H = D * E

    key = jax.random.PRNGKey(0)
    kx, k1, k2, k3, k4, k5, k6, k7, k8 = jax.random.split(key, 9)

    x = jax.random.normal(kx, (B, S, D), dtype=jnp.float32)
    w1 = jax.random.normal(k1, (D, H), dtype=jnp.float32) * 0.02
    b1 = jax.random.normal(k2, (1, H), dtype=jnp.float32) * 0.02
    w2 = jax.random.normal(k3, (H, D), dtype=jnp.float32) * 0.02
    b2 = jax.random.normal(k4, (1, D), dtype=jnp.float32) * 0.02

    ref = _reference(x.reshape(B * S, D), w1, b1, w2, b2).reshape(B, S, D)

    # 1) f32 path (bit-faithful to the module numerics) — resident-weight kernel.
    out = jax.block_until_ready(flex_feed_forward(x, w1, b1, w2, b2))
    assert out.shape == (B, S, D)
    assert jnp.allclose(out, ref, atol=1e-5, rtol=1e-5)

    # 2) bf16 MXU operands, f32 accumulation; weights stored in bf16 by the
    #    caller (no per-call wrapper casts). Looser tolerance from bf16 rounding.
    w1_bf, w2_bf = w1.astype(jnp.bfloat16), w2.astype(jnp.bfloat16)
    out_bf16 = jax.block_until_ready(
        flex_feed_forward(x, w1_bf, b1, w2_bf, b2, compute_dtype=jnp.bfloat16))
    assert out_bf16.shape == (B, S, D)
    assert jnp.allclose(out_bf16, ref, atol=2e-2, rtol=2e-2)

    # 3) Force the hidden-tiled accumulator path (H2=256 with th=128).
    H2 = 256
    w1b = jax.random.normal(k5, (D, H2), dtype=jnp.float32) * 0.02
    b1b = jax.random.normal(k6, (1, H2), dtype=jnp.float32) * 0.02
    w2b = jax.random.normal(k7, (H2, D), dtype=jnp.float32) * 0.02
    b2b = jax.random.normal(k8, (1, D), dtype=jnp.float32) * 0.02
    ref2 = _reference(x.reshape(B * S, D), w1b, b1b, w2b, b2b).reshape(B, S, D)
    out2 = jax.block_until_ready(flex_feed_forward(x, w1b, b1b, w2b, b2b, th=128))
    assert out2.shape == (B, S, D)
    assert jnp.allclose(out2, ref2, atol=1e-5, rtol=1e-5)

    print("KERNEL_OK")
</pallas_src>

<mosaic_0001>
module attributes {stable_mosaic.version = 11 : i64} {
  func.func @_ffn_kernel_resident(%arg0: i32, %arg1: memref<8x128xf32, #tpu.memory_space<vmem>>, %arg2: memref<128x128xf32, #tpu.memory_space<vmem>>, %arg3: memref<1x128xf32, #tpu.memory_space<vmem>>, %arg4: memref<128x128xf32, #tpu.memory_space<vmem>>, %arg5: memref<1x128xf32, #tpu.memory_space<vmem>>, %arg6: memref<8x128xf32, #tpu.memory_space<vmem>>) attributes {dimension_semantics = [#tpu.dimension_semantics<parallel>], iteration_bounds = array<i64: 2>, scalar_prefetch = 0 : i64, scratch_operands = 0 : i64, tpu.core_type = #tpu.core_type<tc>, window_params = [{transform_indices = @transform_0, window_bounds = array<i64: 8, 128>}, {pipeline_mode = #tpu.pipeline_mode<synchronous>, transform_indices = @transform_1, window_bounds = array<i64: 128, 128>}, {pipeline_mode = #tpu.pipeline_mode<synchronous>, transform_indices = @transform_2, window_bounds = array<i64: 1, 128>}, {pipeline_mode = #tpu.pipeline_mode<synchronous>, transform_indices = @transform_3, window_bounds = array<i64: 128, 128>}, {pipeline_mode = #tpu.pipeline_mode<synchronous>, transform_indices = @transform_4, window_bounds = array<i64: 1, 128>}, {transform_indices = @transform_5, window_bounds = array<i64: 8, 128>}]} {
    %c0 = arith.constant 0 : index
    %c0_0 = arith.constant 0 : index
    %0 = vector.load %arg1[%c0, %c0_0] : memref<8x128xf32, #tpu.memory_space<vmem>>, vector<8x128xf32>
    %c0_1 = arith.constant 0 : index
    %c0_2 = arith.constant 0 : index
    %1 = vector.load %arg2[%c0_1, %c0_2] : memref<128x128xf32, #tpu.memory_space<vmem>>, vector<128x128xf32>
    %c0_3 = arith.constant 0 : index
    %c0_4 = arith.constant 0 : index
    %2 = vector.load %arg4[%c0_3, %c0_4] : memref<128x128xf32, #tpu.memory_space<vmem>>, vector<128x128xf32>
    %cst = arith.constant dense<0.000000e+00> : vector<8x128xf32>
    %3 = tpu.matmul %0, %1, %cst {dimension_numbers = #tpu.dot_dimension_numbers<[1], [0], [0], [1], [0, 0, 1, 1], [], []>} : vector<8x128xf32>, vector<128x128xf32>, vector<8x128xf32> -> vector<8x128xf32>
    %c0_5 = arith.constant 0 : index
    %c0_6 = arith.constant 0 : index
    %4 = vector.load %arg3[%c0_5, %c0_6] : memref<1x128xf32, #tpu.memory_space<vmem>>, vector<1x128xf32>
    %5 = vector.broadcast %4 : vector<1x128xf32> to vector<8x128xf32>
    %6 = arith.addf %3, %5 : vector<8x128xf32>
    %cst_7 = arith.constant 5.000000e-01 : f32
    %7 = vector.broadcast %cst_7 : f32 to vector<8x128xf32>
    %8 = arith.mulf %6, %7 : vector<8x128xf32>
    %cst_8 = arith.constant 1.41421354 : f32
    %9 = vector.broadcast %cst_8 : f32 to vector<8x128xf32>
    %10 = arith.divf %6, %9 : vector<8x128xf32>
    %11 = math.erf %10 : vector<8x128xf32>
    %cst_9 = arith.constant 1.000000e+00 : f32
    %12 = vector.broadcast %cst_9 : f32 to vector<8x128xf32>
    %13 = arith.addf %12, %11 : vector<8x128xf32>
    %14 = arith.mulf %8, %13 : vector<8x128xf32>
    %cst_10 = arith.constant dense<0.000000e+00> : vector<8x128xf32>
    %15 = tpu.matmul %14, %2, %cst_10 {dimension_numbers = #tpu.dot_dimension_numbers<[1], [0], [0], [1], [0, 0, 1, 1], [], []>} : vector<8x128xf32>, vector<128x128xf32>, vector<8x128xf32> -> vector<8x128xf32>
    %c0_11 = arith.constant 0 : index
    %c0_12 = arith.constant 0 : index
    %16 = vector.load %arg5[%c0_11, %c0_12] : memref<1x128xf32, #tpu.memory_space<vmem>>, vector<1x128xf32>
    %17 = vector.broadcast %16 : vector<1x128xf32> to vector<8x128xf32>
    %18 = arith.addf %15, %17 : vector<8x128xf32>
    %c0_13 = arith.constant 0 : index
    %c0_14 = arith.constant 0 : index
    %19 = vector.load %arg6[%c0_13, %c0_14] : memref<8x128xf32, #tpu.memory_space<vmem>>, vector<8x128xf32>
    tpu.vector_store %arg6[%c0_13, %c0_14], %18 {strides = array<i32>} : memref<8x128xf32, #tpu.memory_space<vmem>>, vector<8x128xf32>,
    return
  }
  func.func @transform_0(%arg0: i32) -> (i32, i32) {
    %c0_i32 = arith.constant 0 : i32
    %c0_i32_0 = arith.constant 0 : i32
    return %arg0, %c0_i32 : i32, i32
  }
  func.func @transform_1(%arg0: i32) -> (i32, i32) {
    %c0_i32 = arith.constant 0 : i32
    %c0_i32_0 = arith.constant 0 : i32
    %c0_i32_1 = arith.constant 0 : i32
    return %c0_i32, %c0_i32_0 : i32, i32
  }
  func.func @transform_2(%arg0: i32) -> (i32, i32) {
    %c0_i32 = arith.constant 0 : i32
    %c0_i32_0 = arith.constant 0 : i32
    %c0_i32_1 = arith.constant 0 : i32
    return %c0_i32, %c0_i32_0 : i32, i32
  }
  func.func @transform_3(%arg0: i32) -> (i32, i32) {
    %c0_i32 = arith.constant 0 : i32
    %c0_i32_0 = arith.constant 0 : i32
    %c0_i32_1 = arith.constant 0 : i32
    return %c0_i32, %c0_i32_0 : i32, i32
  }
  func.func @transform_4(%arg0: i32) -> (i32, i32) {
    %c0_i32 = arith.constant 0 : i32
    %c0_i32_0 = arith.constant 0 : i32
    %c0_i32_1 = arith.constant 0 : i32
    return %c0_i32, %c0_i32_0 : i32, i32
  }
  func.func @transform_5(%arg0: i32) -> (i32, i32) {
    %c0_i32 = arith.constant 0 : i32
    %c0_i32_0 = arith.constant 0 : i32
    return %arg0, %c0_i32 : i32, i32
  }
}

</mosaic_0001>

<bundles_post_ra>
// kernel: flex_feed_forward.1
= control target key start
LH: loop header
LB: loop body
LE: loop exit
PB: predicated region body
PF: predicated region fallthrough
CT: control target
= control target key end

     0   :  { %s470_s18 = smov 0   ;;  %s596_s0 = inlined_call_operand.vmem [shape: f32[16,128], index: 0, kind: input, shape index: {}]   ;;  %s597_s1 = inlined_call_operand.vmem [shape: f32[128,128], index: 1, kind: input, shape index: {}]   ;;  %s598_s2 = inlined_call_operand.vmem [shape: f32[1,128], index: 2, kind: input, shape index: {}]   ;;  %s599_s3 = inlined_call_operand.vmem [shape: f32[128,128], index: 3, kind: input, shape index: {}]   ;;  %s600_s4 = inlined_call_operand.vmem [shape: f32[1,128], index: 4, kind: input, shape index: {}]   ;;  %s601_s5 = inlined_call_operand.vmem [shape: f32[16,128], index: 5, kind: output, shape index: {}]  }
   0x1 LB: > { %s406_s19 = sadd.s32 4294967295, %s437_s18   ;;  %p410_p0 = scmp.ge.s32.totalorder %s437_s18, 1  ;;  %s437_s18 = sphi %s470_s18, %s15_s18  }
   0x2   : > { %p186_p1 = scmp.lt.s32.totalorder %s437_s18, 3 }
   0x4   : > { %p187_p2 = pnand %p410_p0, %p186_p1 }
   0x5   : > { %p212_p3 = scmp.lt.s32.totalorder (!%p187_p2), %s406_s19, 1 }
   0x6   : > { %190 = sbr.rel (%p187_p2) target bundleno = 351 (0x15f), region = 40 }
   0xb   : > { %v236_v0 = vld [vmem:[%s597_s1 + $0x78] sm:$0xff]  ;;  %v235_v1 = vld [vmem:[%s597_s1 + $0x70] sm:$0xff]  ;;  %v234_v2 = vld [vmem:[%s597_s1 + $0x68] sm:$0xff]  ;;  %s603_s19 = smov (!%p212_p3, %s406_s19), 1  ;;  %v439_v17 = vmov 1.4142135  }
   0xc   : > { %257 = vmatpush.msra.mxu0 %v236_v0  ;;  %v233_v3 = vld [vmem:[%s597_s1 + $0x60] sm:$0xff]  ;;  %v232_v4 = vld [vmem:[%s597_s1 + $0x58] sm:$0xff]  ;;  %v231_v5 = vld [vmem:[%s597_s1 + $0x50] sm:$0xff]  ;;  %s411_s23 = sshll.u32 %s603_s19, 3  ;;  %427 = vrcp.f32 %v439_v17 }
   0xd   : > { %v230_v6 = vld [vmem:[%s597_s1 + $0x48] sm:$0xff]  ;;  %v229_v7 = vld [vmem:[%s597_s1 + $0x40] sm:$0xff]  ;;  %v228_v8 = vld [vmem:[%s597_s1 + $0x38] sm:$0xff]  ;;  %s215_s30 = scalar_lea.vmem %s596_s0, %s411_s23  ;;  %s219_s27 = scalar_lea.vmem %s601_s5, %s411_s23 }
   0xe   : > { %258 = vmatpush.msra.mxu0 %v235_v1  ;;  %v227_v9 = vld [vmem:[%s597_s1 + $0x30] sm:$0xff]  ;;  %v226_v10 = vld [vmem:[%s597_s1 + $0x28] sm:$0xff]  ;;  %v225_v11 = vld [vmem:[%s597_s1 + $0x20] sm:$0xff] }
   0xf   : > { %v224_v12 = vld [vmem:[%s597_s1 + $0x18] sm:$0xff]  ;;  %v223_v13 = vld [vmem:[%s597_s1 + $0x10] sm:$0xff]  ;;  %v222_v14 = vld [vmem:[%s597_s1 + $0x8] sm:$0xff] }
  0x10   : > { %259 = vmatpush.msra.mxu0 %v234_v2  ;;  %v221_v15 = vld [vmem:[%s597_s1] sm:$0xff]  ;;  %v252_v21 = vld [vmem:[%s599_s3 + $0x78] sm:$0xff]  ;;  %v251_v23 = vld [vmem:[%s599_s3 + $0x70] sm:$0xff] }
  0x11   : > { %v220_v16 = vld [vmem:[%s215_s30] sm:$0xff]  ;;  %332 = vmatpush.msra.mxu1 %v252_v21  ;;  %v250_v24 = vld [vmem:[%s599_s3 + $0x68] sm:$0xff]  ;;  %v248_v28 = vld [vmem:[%s599_s3 + $0x58] sm:$0xff] }
  0x12   : > { %260 = vmatpush.msra.mxu0 %v233_v3  ;;  %v428_v18 = vpop.eup %427  ;;  %v249_v26 = vld [vmem:[%s599_s3 + $0x60] sm:$0xff]  ;;  %v247_v29 = vld [vmem:[%s599_s3 + $0x50] sm:$0xff]  ;;  %v246_v32 = vld [vmem:[%s599_s3 + $0x48] sm:$0xff] }
  0x13   : > { %v279_v19 = vmul.f32 1.4142135, %v428_v18  ;;  %333 = vmatpush.msra.mxu1 %v251_v23  ;;  %v425_v27 = vld [vmem:[%s598_s2] ss:$0 sm:$0xff]  ;;  %vm283_vm0 = vweird.f32 %v428_v18  ;;  %v244_v36 = vld [vmem:[%s599_s3 + $0x38] sm:$0xff]  ;;  %v243_v38 = vld [vmem:[%s599_s3 + $0x30] sm:$0xff] }
  0x14   : > { %261 = vmatpush.msra.mxu0 %v232_v4  ;;  %v245_v34 = vld [vmem:[%s599_s3 + $0x40] sm:$0xff]  ;;  %v242_v40 = vld [vmem:[%s599_s3 + $0x28] sm:$0xff]  ;;  %v240_v46 = vld [vmem:[%s599_s3 + $0x18] sm:$0xff] }
  0x15   : > { %v280_v20 = vsub.f32 1.0, %v279_v19  ;;  %334 = vmatpush.msra.mxu1 %v250_v24  ;;  %v241_v43 = vld [vmem:[%s599_s3 + $0x20] sm:$0xff]  ;;  %v239_v49 = vld [vmem:[%s599_s3 + $0x10] sm:$0xff]  ;;  %v238_v52 = vld [vmem:[%s599_s3 + $0x8] sm:$0xff] }
  0x16   : > { %262 = vmatpush.msra.mxu0 %v231_v5  ;;  %v237_v54 = vld [vmem:[%s599_s3] sm:$0xff] }
  0x17   : > { %v281_v22 = vmul.f32 %v428_v18, %v280_v20  ;;  %335 = vmatpush.msra.mxu1 %v249_v26 }
  0x18   : > { %263 = vmatpush.msra.mxu0 %v230_v6 }
  0x19   : > { %v282_v25 = vadd.f32 %v428_v18, %v281_v22  ;;  %336 = vmatpush.msra.mxu1 %v248_v28 }
  0x1a   : > { %264 = vmatpush.msra.mxu0 %v229_v7 }
  0x1b   : > { %v284_v31 = vsel %vm283_vm0, %v428_v18, %v282_v25  ;;  %337 = vmatpush.msra.mxu1 %v247_v29  ;;  %v426_v18 = vld [vmem:[%s600_s4] ss:$0 sm:$0xff] }
  0x1c   : > { %265 = vmatpush.msra.mxu0 %v228_v8 }
  0x1d   : > { %338 = vmatpush.msra.mxu1 %v246_v32 }
  0x1e   : > { %266 = vmatpush.msra.mxu0 %v227_v9 }
  0x1f   : > { %339 = vmatpush.msra.mxu1 %v245_v34 }
  0x20   : > { %267 = vmatpush.msra.mxu0 %v226_v10 }
  0x21   : > { %340 = vmatpush.msra.mxu1 %v244_v36 }
  0x22   : > { %268 = vmatpush.msra.mxu0 %v225_v11 }
  0x23   : > { %341 = vmatpush.msra.mxu1 %v243_v38 }
  0x24   : > { %269 = vmatpush.msra.mxu0 %v224_v12 }
  0x25   : > { %342 = vmatpush.msra.mxu1 %v242_v40 }
  0x26   : > { %270 = vmatpush.msra.mxu0 %v223_v13 }
  0x27   : > { %343 = vmatpush.msra.mxu1 %v241_v43 }
  0x28   : > { %271 = vmatpush.msra.mxu0 %v222_v14 }
  0x29   : > { %344 = vmatpush.msra.mxu1 %v240_v46 }
  0x2a   : > { %272 = vmatpush.msra.mxu0 %v221_v15 }
  0x2b   : > { %273 = vmatmul.f32.vlgmr.msra.gmra.mxu0 %v220_v16  ;;  %345 = vmatpush.msra.mxu1 %v239_v49 }
  0x2d   : > { %346 = vmatpush.msra.mxu1 %v238_v52 }
  0x2f   : > { %347 = vmatpush.msra.mxu1 %v237_v54 }
  0xa8   : > { %v274_v30 = vpop.f32.mrf.mxu0 }
  0xa9   : > { %v275_v33 = vadd.f32 %v425_v27, %v274_v30 }
  0xab   : > { %v285_v35 = vmul.f32 %v284_v31, %v275_v33  ;;  %v277_v15 = vmul.f32 0.5, %v275_v33 }
  0xad   : > { %v286_v37 = vmul.f32 %v285_v35, %v285_v35 }
  0xaf   : > { %v287_v39 = vmin.f32 %v286_v37, 16.0 }
  0xb1   : > { %v288_v41 = vmul.f32 2.1237322e-06, %v287_v39  ;;  %v299_v42 = vmul.f32 3.8918573e-05, %v287_v39 }
  0xb3   : > { %v289_v44 = vadd.f32 0.00028619796, %v288_v41  ;;  %v300_v45 = vadd.f32 0.001143296, %v299_v42 }
  0xb5   : > { %v290_v47 = vmul.f32 %v289_v44, %v287_v39  ;;  %v301_v48 = vmul.f32 %v300_v45, %v287_v39 }
  0xb7   : > { %v302_v50 = vadd.f32 0.014752088, %v301_v48  ;;  %v291_v51 = vadd.f32 0.0036580483, %v290_v47 }
  0xb9   : > { %v303_v53 = vmul.f32 %v302_v50, %v287_v39  ;;  %v292_v56 = vmul.f32 %v291_v51, %v287_v39 }
  0xbb   : > { %v304_v55 = vadd.f32 0.112945676, %v303_v53  ;;  %v293_v59 = vadd.f32 0.05243302, %v292_v56 }
  0xbd   : > { %v305_v57 = vmul.f32 %v304_v55, %v287_v39  ;;  %v294_v62 = vmul.f32 %v293_v59, %v287_v39 }
  0xbf   : > { %v306_v58 = vadd.f32 0.4994258, %v305_v57  ;;  %v295_v63 = vadd.f32 0.18741608, %v294_v62 }
  0xc1   : > { %v307_v60 = vmul.f32 %v306_v58, %v287_v39  ;;  %v296_v1 = vmul.f32 %v295_v63, %v287_v39 }
  0xc3   : > { %v308_v61 = vadd.f32 1.0, %v307_v60  ;;  %v297_v5 = vadd.f32 1.1283791, %v296_v1 }
  0xc5   : > { %429 = vrcp.f32 %v308_v61  ;;  %v320_v4 = vand.u32 2147483648, %v308_v61  ;;  %v318_v7 = vand.u32 2147483647, %v308_v61  ;;  %vm314_vm2 = vweird.f32 %v308_v61 }
  0xc6   : > { %v298_v10 = vmul.f32 %v297_v5, %v285_v35 }
  0xc7   : > { %v321_v9 = vor.u32 1.1754944e-38, %v320_v4  ;;  %vm319_vm4 = vcmp.eq.f32.partialorder %v318_v7, 8.507059e+37 }
  0xcb   : > { %v430_v0 = vpop.eup %429 }
  0xcc   : > { %v310_v2 = vmul.f32 %v430_v0, %v308_v61  ;;  %vm315_vm1 = vweird.f32 %v430_v0 }
  0xcd   : > { %vm316_vm3 = vmor %vm314_vm2, %vm315_vm1 }
  0xce   : > { %v311_v3 = vsub.f32 1.0, %v310_v2 }
  0xd0   : > { %v312_v6 = vmul.f32 %v430_v0, %v311_v3 }
  0xd2   : > { %v313_v8 = vadd.f32 %v430_v0, %v312_v6 }
  0xd4   : > { %v317_v11 = vsel %vm316_vm3, %v430_v0, %v313_v8 }
  0xd5   : > { %v322_v12 = vsel %vm319_vm4, %v321_v9, %v317_v11 }
  0xd6   : > { %v323_v13 = vmul.f32 %v322_v12, %v298_v10 }
  0xd8   : > { %v413_v14 = vclamps-f32 %v323_v13, 1.0 }
  0xda   : > { %v326_v16 = vadd.f32 1.0, %v413_v14 }
  0xdc   : > { %v327_v17 = vmul.f32 %v326_v16, %v277_v15 }
  0xde   : > { %348 = vmatmul.f32.vlgmr.msra.gmra.mxu1 %v327_v17 }
 0x15b   : > { %v349_v19 = vpop.f32.mrf.mxu1 }
 0x15c   : > { %v350_v20 = vadd.f32 %v426_v18, %v349_v19 }
 0x15e   : > { %352 = vst [vmem:[%s219_s27] sm:$0xff] %v350_v20 }
 0x15f PF: > { %s15_s18 = sadd.s32 1, %s437_s18  }
 0x160   : > { %p12_p4 = scmp.ge.s32.totalorder %s15_s18, 4  }
 0x162   :  { %14 = sbr.rel (!%p12_p4) target bundleno = 1 (0x1), region = 70 }

</bundles_post_ra>
